<compile_context>
chip_gen: v6e
topology: v6e:2x2x1
jax: 0.10.0
libtpu: 0.0.40
codegen_flags: <defaults>
</compile_context>

<pallas_src>
import jax
import jax.numpy as jnp
from jax.experimental import pallas as pl
from jax.experimental.pallas import tpu as pltpu


def _round_up(x, m):
    return (x + m - 1) // m * m


def _pad2d(x, rows, cols):
    pr, pc = rows - x.shape[0], cols - x.shape[1]
    if pr or pc:
        x = jnp.pad(x, ((0, pr), (0, pc)))
    return x


def _pick_tile(n_pad, cap, min_tiles=1):
    """Largest multiple of 128 that divides n_pad, is <= cap, and (when
    possible) leaves at least `min_tiles` tiles along the axis."""
    m = n_pad // 128
    best = 128
    d = 1
    while 128 * d <= min(cap, n_pad):
        if m % d == 0 and (m // d) >= min_tiles:
            best = 128 * d
        d += 1
    return best


# ---- Pass 0 (only for large C_in): t = features @ W, row-tiled --------------
def _feat_xform_kernel(feat_ref, w_ref, t_ref):
    t_ref[...] = jnp.dot(
        feat_ref[...], w_ref[...], preferred_element_type=jnp.float32
    ).astype(t_ref.dtype)


# ---- Pass 1 (fused, small C_in): v = filt * (wavelets_inv @ (features @ W)) -
def _pass1_fused_kernel(wavinv_ref, feat_ref, w_ref, filt_ref, v_ref, acc_ref):
    k = pl.program_id(1)

    @pl.when(k == 0)
    def _():
        acc_ref[...] = jnp.zeros_like(acc_ref)

    # Recompute the (k_tile, c_pad) slice of t on the fly; C_in is tiny so this
    # is a negligible MXU prologue and t never touches HBM.
    t_tile = jnp.dot(feat_ref[...], w_ref[...], preferred_element_type=jnp.float32)
    acc_ref[...] += jnp.dot(
        wavinv_ref[...], t_tile.astype(wavinv_ref.dtype),
        preferred_element_type=jnp.float32,
    )

    @pl.when(k == pl.num_programs(1) - 1)
    def _():
        # diag(filter) applied as a per-row scale in the finalize (VPU, free).
        v_ref[...] = (filt_ref[...] * acc_ref[...]).astype(v_ref.dtype)


# ---- Pass 1 (unfused, large C_in): v = filt * (wavelets_inv @ t) ------------
def _pass1_kernel(wavinv_ref, t_ref, filt_ref, v_ref, acc_ref):
    k = pl.program_id(1)

    @pl.when(k == 0)
    def _():
        acc_ref[...] = jnp.zeros_like(acc_ref)

    acc_ref[...] += jnp.dot(
        wavinv_ref[...], t_ref[...], preferred_element_type=jnp.float32
    )

    @pl.when(k == pl.num_programs(1) - 1)
    def _():
        v_ref[...] = (filt_ref[...] * acc_ref[...]).astype(v_ref.dtype)


# ---- Pass 2: out = wavelets @ v ----------------------------------------------
def _make_pass2_kernel(k_tile, v_resident):
    align = k_tile & (-k_tile)  # largest power-of-two divisor (>= 128)

    def kernel(wav_ref, v_ref, out_ref, acc_ref):
        k = pl.program_id(1)

        @pl.when(k == 0)
        def _():
            acc_ref[...] = jnp.zeros_like(acc_ref)

        if v_resident:
            # v lives fully in VMEM (constant-index BlockSpec); slice its
            # k-tile dynamically.
            off = pl.multiple_of(k * k_tile, align)
            v_blk = v_ref[pl.ds(off, k_tile), :]
        else:
            v_blk = v_ref[...]

        acc_ref[...] += jnp.dot(
            wav_ref[...], v_blk, preferred_element_type=jnp.float32
        )

        @pl.when(k == pl.num_programs(1) - 1)
        def _():
            out_ref[...] = acc_ref[...].astype(out_ref.dtype)

    return kernel


def gwnn_layer(features, weight_matrix, wavelets, wavelets_inv, filt, *,
               row_tile_cap=512, k_tile_cap=2048, fuse_cin_max=128,
               v_resident_bytes_max=4 * 1024 * 1024):
    """Pallas implementation of GWNNLayer.forward.

    features:      [N, C_in]
    weight_matrix: [C_in, C_out]
    wavelets:      [N, N]
    wavelets_inv:  [N, N]
    filt:          [>=N] graph-wavelet filter diagonal
    returns:       [N, C_out] (features dtype)
    """
    N, c_in = features.shape
    c_in_w, c_out = weight_matrix.shape
    assert c_in_w == c_in, "weight_matrix in_channels mismatch"
    assert wavelets.shape == (N, N) and wavelets_inv.shape == (N, N)
    assert filt.shape[0] >= N, "filter must have at least N entries"

    out_dtype = features.dtype
    stream_dtype = jnp.bfloat16   # wavelet / intermediate streaming dtype

    # Lane-dense channel dim (multiple of 128) -> unmasked stores.
    c_pad = _round_up(c_out, 128)
    n_pad = _round_up(N, 128)

    # Row tiles: >= 2 whenever possible (dual-TensorCore sharding on v7x).
    row_tile = _pick_tile(n_pad, row_tile_cap, min_tiles=2)
    # k tiles: as large as allowed (big streamed blocks hide per-step overhead).
    k_tile = _pick_tile(n_pad, k_tile_cap, min_tiles=1)
    n_row = n_pad // row_tile
    n_k = n_pad // k_tile

    # Wrapper-side padding / dtype plumbing (no-ops when already aligned).
    feat_p = _pad2d(features.astype(jnp.float32), n_pad, c_in)
    w_p = _pad2d(weight_matrix.astype(jnp.float32), c_in, c_pad)
    wav_p = _pad2d(wavelets.astype(stream_dtype), n_pad, n_pad)
    wavinv_p = _pad2d(wavelets_inv.astype(stream_dtype), n_pad, n_pad)
    filt_p = _pad2d(filt[:N].astype(jnp.float32).reshape(N, 1), n_pad, 1)

    vmem_limit = 32 * 1024 * 1024
    cparams_rows = pltpu.CompilerParams(
        dimension_semantics=("parallel",), vmem_limit_bytes=vmem_limit)
    cparams_gemm = pltpu.CompilerParams(
        dimension_semantics=("parallel", "arbitrary"), vmem_limit_bytes=vmem_limit)

    fused = c_in <= fuse_cin_max

    # ---- Pass 1: v = filt * (wavelets_inv @ t) ------------------------------
    if fused:
        v = pl.pallas_call(
            _pass1_fused_kernel,
            out_shape=jax.ShapeDtypeStruct((n_pad, c_pad), stream_dtype),
            grid_spec=pltpu.PrefetchScalarGridSpec(
                num_scalar_prefetch=0,
                grid=(n_row, n_k),
                in_specs=[
                    pl.BlockSpec((row_tile, k_tile), lambda i, k: (i, k)),  # wavinv
                    pl.BlockSpec((k_tile, c_in), lambda i, k: (k, 0)),      # features
                    pl.BlockSpec((c_in, c_pad), lambda i, k: (0, 0)),       # W (resident)
                    pl.BlockSpec((row_tile, 1), lambda i, k: (i, 0)),       # filter
                ],
                out_specs=pl.BlockSpec((row_tile, c_pad), lambda i, k: (i, 0)),
                scratch_shapes=[pltpu.VMEM((row_tile, c_pad), jnp.float32)],
            ),
            compiler_params=cparams_gemm,
        )(wavinv_p, feat_p, w_p, filt_p)
    else:
        # Pass 0: t = features @ W, written once to HBM in bf16.
        t = pl.pallas_call(
            _feat_xform_kernel,
            out_shape=jax.ShapeDtypeStruct((n_pad, c_pad), stream_dtype),
            grid_spec=pltpu.PrefetchScalarGridSpec(
                num_scalar_prefetch=0,
                grid=(n_row,),
                in_specs=[
                    pl.BlockSpec((row_tile, c_in), lambda i: (i, 0)),
                    pl.BlockSpec((c_in, c_pad), lambda i: (0, 0)),
                ],
                out_specs=pl.BlockSpec((row_tile, c_pad), lambda i: (i, 0)),
            ),
            compiler_params=cparams_rows,
        )(feat_p, w_p)

        v = pl.pallas_call(
            _pass1_kernel,
            out_shape=jax.ShapeDtypeStruct((n_pad, c_pad), stream_dtype),
            grid_spec=pltpu.PrefetchScalarGridSpec(
                num_scalar_prefetch=0,
                grid=(n_row, n_k),
                in_specs=[
                    pl.BlockSpec((row_tile, k_tile), lambda i, k: (i, k)),  # wavinv
                    pl.BlockSpec((k_tile, c_pad), lambda i, k: (k, 0)),     # t (bf16)
                    pl.BlockSpec((row_tile, 1), lambda i, k: (i, 0)),       # filter
                ],
                out_specs=pl.BlockSpec((row_tile, c_pad), lambda i, k: (i, 0)),
                scratch_shapes=[pltpu.VMEM((row_tile, c_pad), jnp.float32)],
            ),
            compiler_params=cparams_gemm,
        )(wavinv_p, t, filt_p)

    # ---- Pass 2: out = wavelets @ v ------------------------------------------
    v_resident = (n_pad * c_pad * 2) <= v_resident_bytes_max  # bf16 bytes
    if v_resident:
        v_spec = pl.BlockSpec((n_pad, c_pad), lambda i, k: (0, 0))   # DMA'd once
    else:
        v_spec = pl.BlockSpec((k_tile, c_pad), lambda i, k: (k, 0))  # bf16 stream

    out_p = pl.pallas_call(
        _make_pass2_kernel(k_tile, v_resident),
        out_shape=jax.ShapeDtypeStruct((n_pad, c_pad), out_dtype),
        grid_spec=pltpu.PrefetchScalarGridSpec(
            num_scalar_prefetch=0,
            grid=(n_row, n_k),
            in_specs=[
                pl.BlockSpec((row_tile, k_tile), lambda i, k: (i, k)),  # wavelets
                v_spec,
            ],
            out_specs=pl.BlockSpec((row_tile, c_pad), lambda i, k: (i, 0)),
            scratch_shapes=[pltpu.VMEM((row_tile, c_pad), jnp.float32)],
        ),
        compiler_params=cparams_gemm,
    )(wav_p, v)

    return out_p[:N, :c_out]


# ----------------------------- test harness ----------------------------------
def xavier_uniform(key, shape, dtype=jnp.float32):
    # torch.nn.init.xavier_uniform_: U(-a, a), a = sqrt(6 / (fan_in + fan_out))
    fan_in, fan_out = shape
    a = (6.0 / (fan_in + fan_out)) ** 0.5
    return jax.random.uniform(key, shape, dtype=dtype, minval=-a, maxval=a)


def _reference(features, weight_matrix, wavelets, wavelets_inv, filt):
    hp = jax.lax.Precision.HIGHEST
    t = jnp.matmul(features, weight_matrix, precision=hp)
    u = jnp.matmul(wavelets_inv, t, precision=hp)
    return jnp.matmul(wavelets, filt[: features.shape[0], None] * u, precision=hp)


def _make_inputs(key, n, c_in, c_out):
    k_feat, k_wav, k_winv, k_w, k_f = jax.random.split(key, 5)
    features = jax.random.normal(k_feat, (n, c_in), dtype=jnp.float32)
    wavelets = jax.random.normal(k_wav, (n, n), dtype=jnp.float32)
    wavelets_inv = jax.random.normal(k_winv, (n, n), dtype=jnp.float32)
    weight_matrix = xavier_uniform(k_w, (c_in, c_out))               # xavier_uniform_
    filt = jax.random.uniform(k_f, (n,), minval=0.9, maxval=1.1)     # uniform_(0.9, 1.1)
    return features, weight_matrix, wavelets, wavelets_inv, filt


def _run_case(key, n, c_in, c_out, **kwargs):
    features, weight_matrix, wavelets, wavelets_inv, filt = _make_inputs(
        key, n, c_in, c_out)
    out = jax.block_until_ready(
        gwnn_layer(features, weight_matrix, wavelets, wavelets_inv, filt, **kwargs))
    ref = _reference(features, weight_matrix, wavelets, wavelets_inv, filt)
    assert out.shape == (n, c_out), f"bad shape {out.shape}"
    # bf16 wavelet streaming -> expect ~1% normalized error vs an f32 HIGHEST
    # reference; 5e-2 still catches any indexing / tiling mistake (O(1) error).
    err = jnp.max(jnp.abs(out.astype(jnp.float32) - ref)) / jnp.maximum(
        1.0, jnp.max(jnp.abs(ref)))
    assert bool(jnp.isfinite(err)), "non-finite output"
    assert float(err) < 5e-2, f"mismatch (n={n}, c_in={c_in}): rel err={float(err)}"


if __name__ == "__main__":
    key = jax.random.PRNGKey(0)
    k1, k2, k3 = jax.random.split(key, 3)

    # Case 1: module-sized small shapes (single tile, fused pass-1 path).
    _run_case(k1, n=16, c_in=4, c_out=8)

    # Case 2: multi row/k tiles, padding, fused pass-1, VMEM-resident v.
    _run_case(k2, n=520, c_in=4, c_out=8, row_tile_cap=128, k_tile_cap=256)

    # Case 3: large C_in -> separate pass-0 feature transform path.
    _run_case(k3, n=260, c_in=160, c_out=12)

    print("KERNEL_OK")
</pallas_src>

<mosaic_0001>
module attributes {stable_mosaic.version = 11 : i64} {
  func.func @_pass1_fused_kernel(%arg0: i32, %arg1: i32, %arg2: memref<128x128xbf16, #tpu.memory_space<vmem>>, %arg3: memref<128x4xf32, #tpu.memory_space<vmem>>, %arg4: memref<4x128xf32, #tpu.memory_space<vmem>>, %arg5: memref<128x1xf32, #tpu.memory_space<vmem>>, %arg6: memref<128x128xbf16, #tpu.memory_space<vmem>>, %arg7: memref<128x128xf32, #tpu.memory_space<vmem>>) attributes {dimension_semantics = [#tpu.dimension_semantics<parallel>, #tpu.dimension_semantics<arbitrary>], iteration_bounds = array<i64: 1, 1>, scalar_prefetch = 0 : i64, scratch_operands = 1 : i64, tpu.core_type = #tpu.core_type<tc>, window_params = [{transform_indices = @transform_0, window_bounds = array<i64: 128, 128>}, {transform_indices = @transform_1, window_bounds = array<i64: 128, 4>}, {pipeline_mode = #tpu.pipeline_mode<synchronous>, transform_indices = @transform_2, window_bounds = array<i64: 4, 128>}, {transform_indices = @transform_3, window_bounds = array<i64: 128, 1>}, {transform_indices = @transform_4, window_bounds = array<i64: 128, 128>}]} {
    %c0_i32 = arith.constant 0 : i32
    %0 = arith.cmpi eq, %arg1, %c0_i32 : i32
    %1 = arith.extui %0 : i1 to i32
    %c0_i32_0 = arith.constant 0 : i32
    %2 = arith.cmpi ne, %1, %c0_i32_0 : i32
    scf.if %2 {
      %cst_13 = arith.constant 0.000000e+00 : f32
      %15 = vector.broadcast %cst_13 : f32 to vector<128x128xf32>
      %c0_14 = arith.constant 0 : index
      %c0_15 = arith.constant 0 : index
      %16 = vector.load %arg7[%c0_14, %c0_15] : memref<128x128xf32, #tpu.memory_space<vmem>>, vector<128x128xf32>
      tpu.vector_store %arg7[%c0_14, %c0_15], %15 {strides = array<i32>} : memref<128x128xf32, #tpu.memory_space<vmem>>, vector<128x128xf32>,
    } else {
    }
    %c0 = arith.constant 0 : index
    %c0_1 = arith.constant 0 : index
    %3 = vector.load %arg3[%c0, %c0_1] : memref<128x4xf32, #tpu.memory_space<vmem>>, vector<128x4xf32>
    %c0_2 = arith.constant 0 : index
    %c0_3 = arith.constant 0 : index
    %4 = vector.load %arg4[%c0_2, %c0_3] : memref<4x128xf32, #tpu.memory_space<vmem>>, vector<4x128xf32>
    %cst = arith.constant dense<0.000000e+00> : vector<128x128xf32>
    %5 = tpu.matmul %3, %4, %cst {dimension_numbers = #tpu.dot_dimension_numbers<[1], [0], [0], [1], [0, 0, 1, 1], [], []>} : vector<128x4xf32>, vector<4x128xf32>, vector<128x128xf32> -> vector<128x128xf32>
    %c0_4 = arith.constant 0 : index
    %c0_5 = arith.constant 0 : index
    %6 = vector.load %arg7[%c0_4, %c0_5] : memref<128x128xf32, #tpu.memory_space<vmem>>, vector<128x128xf32>
    %c0_6 = arith.constant 0 : index
    %c0_7 = arith.constant 0 : index
    %7 = vector.load %arg2[%c0_6, %c0_7] : memref<128x128xbf16, #tpu.memory_space<vmem>>, vector<128x128xbf16>
    %8 = arith.truncf %5 : vector<128x128xf32> to vector<128x128xbf16>
    %cst_8 = arith.constant dense<0.000000e+00> : vector<128x128xf32>
    %9 = tpu.matmul %7, %8, %cst_8 {dimension_numbers = #tpu.dot_dimension_numbers<[1], [0], [0], [1], [0, 0, 1, 1], [], []>} : vector<128x128xbf16>, vector<128x128xbf16>, vector<128x128xf32> -> vector<128x128xf32>
    %10 = arith.addf %6, %9 : vector<128x128xf32>
    %c0_9 = arith.constant 0 : index
    %c0_10 = arith.constant 0 : index
    %11 = vector.load %arg7[%c0_9, %c0_10] : memref<128x128xf32, #tpu.memory_space<vmem>>, vector<128x128xf32>
    tpu.vector_store %arg7[%c0_9, %c0_10], %10 {strides = array<i32>} : memref<128x128xf32, #tpu.memory_space<vmem>>, vector<128x128xf32>,
    %c0_i32_11 = arith.constant 0 : i32
    %12 = arith.cmpi eq, %arg1, %c0_i32_11 : i32
    %13 = arith.extui %12 : i1 to i32
    %c0_i32_12 = arith.constant 0 : i32
    %14 = arith.cmpi ne, %13, %c0_i32_12 : i32
    scf.if %14 {
      %c0_13 = arith.constant 0 : index
      %c0_14 = arith.constant 0 : index
      %15 = vector.load %arg5[%c0_13, %c0_14] : memref<128x1xf32, #tpu.memory_space<vmem>>, vector<128x1xf32>
      %c0_15 = arith.constant 0 : index
      %c0_16 = arith.constant 0 : index
      %16 = vector.load %arg7[%c0_15, %c0_16] : memref<128x128xf32, #tpu.memory_space<vmem>>, vector<128x128xf32>
      %17 = vector.broadcast %15 : vector<128x1xf32> to vector<128x128xf32>
      %18 = arith.mulf %17, %16 : vector<128x128xf32>
      %19 = arith.truncf %18 : vector<128x128xf32> to vector<128x128xbf16>
      %c0_17 = arith.constant 0 : index
      %c0_18 = arith.constant 0 : index
      %20 = vector.load %arg6[%c0_17, %c0_18] : memref<128x128xbf16, #tpu.memory_space<vmem>>, vector<128x128xbf16>
      tpu.vector_store %arg6[%c0_17, %c0_18], %19 {strides = array<i32>} : memref<128x128xbf16, #tpu.memory_space<vmem>>, vector<128x128xbf16>,
    } else {
    }
    return
  }
  func.func @transform_0(%arg0: i32, %arg1: i32) -> (i32, i32) {
    %c0_i32 = arith.constant 0 : i32
    return %arg0, %arg1 : i32, i32
  }
  func.func @transform_1(%arg0: i32, %arg1: i32) -> (i32, i32) {
    %c0_i32 = arith.constant 0 : i32
    %c0_i32_0 = arith.constant 0 : i32
    return %arg1, %c0_i32 : i32, i32
  }
  func.func @transform_2(%arg0: i32, %arg1: i32) -> (i32, i32) {
    %c0_i32 = arith.constant 0 : i32
    %c0_i32_0 = arith.constant 0 : i32
    %c0_i32_1 = arith.constant 0 : i32
    return %c0_i32, %c0_i32_0 : i32, i32
  }
  func.func @transform_3(%arg0: i32, %arg1: i32) -> (i32, i32) {
    %c0_i32 = arith.constant 0 : i32
    %c0_i32_0 = arith.constant 0 : i32
    return %arg0, %c0_i32 : i32, i32
  }
  func.func @transform_4(%arg0: i32, %arg1: i32) -> (i32, i32) {
    %c0_i32 = arith.constant 0 : i32
    %c0_i32_0 = arith.constant 0 : i32
    return %arg0, %c0_i32 : i32, i32
  }
}

</mosaic_0001>

<bundles_post_ra>
// kernel: tpu_custom_call.1
= control target key start
LH: loop header
LB: loop body
LE: loop exit
PB: predicated region body
PF: predicated region fallthrough
CT: control target
= control target key end

     0   :  { %vm105_vm0 = vcmask 1043456   ;;  %vm56_vm1 = vcmask 31744   ;;  %s1116_s0 = inlined_call_operand.vmem [shape: bf16[128,128], index: 0, kind: input, shape index: {}]   ;;  %s1117_s1 = inlined_call_operand.vmem [shape: f32[128,4], index: 1, kind: input, shape index: {}]   ;;  %s1118_s2 = inlined_call_operand.vmem [shape: f32[4,128], index: 2, kind: input, shape index: {}]   ;;  %s1119_s3 = inlined_call_operand.vmem [shape: f32[128,1], index: 3, kind: input, shape index: {}]   ;;  %s1120_s4 = inlined_call_operand.hbm [shape: bf16[128,128], index: 4, kind: output, shape index: {}]  }
   0x1   :  { %v55_v0 = vld [vmem:[%s1118_s2] sm:$0xf]  ;;  %v40_v2 = vld [vmem:[%s1117_s1 + $0x8] sm:$0xff]  ;;  %v41_v3 = vld [vmem:[%s1117_s1 + $0x10] sm:$0xff] }
   0x2   :  { %v39_v1 = vld [vmem:[%s1117_s1] sm:$0xff]  ;;  %835 = vmatprep.subr.msk.mxu0 %vm105_vm0, %v55_v0  ;;  %v42_v4 = vld [vmem:[%s1117_s1 + $0x18] sm:$0xff]  ;;  %v44_v6 = vld [vmem:[%s1117_s1 + $0x28] sm:$0xff] }
   0x3   :  { %837 = vmatprep.mubr.msk.f32.mxu0 %vm56_vm1, %v39_v1  ;;  %836 = vmatpush3.msk.msra.mxu0 %vm105_vm0, %v55_v0  ;;  %v43_v5 = vld [vmem:[%s1117_s1 + $0x20] sm:$0xff]  ;;  %v45_v7 = vld [vmem:[%s1117_s1 + $0x30] sm:$0xff] }
   0x4   :  { %838 = vmatmul.mubr.msk.f32.vlgmr.msra.gmra.mxu0 %vm56_vm1, %v40_v2 }
   0x5   :  { %840 = vmatprep.mubr.msk.f32.mxu0 %vm56_vm1, %v41_v3 }
   0x8   :  { %841 = vmatmul.mubr.msk.f32.gmra.mxu0 %vm56_vm1, %v42_v4 }
   0x9   :  { %843 = vmatprep.mubr.msk.f32.mxu0 %vm56_vm1, %v43_v5 }
   0xc   :  { %844 = vmatmul.mubr.msk.f32.gmra.mxu0 %vm56_vm1, %v44_v6 }
   0xd   :  { %9 = vsyncpa [#allocation4], 0  ;;  %846 = vmatprep.mubr.msk.f32.mxu0 %vm56_vm1, %v45_v7  ;;  %v46_v8 = vld [vmem:[%s1117_s1 + $0x38] sm:$0xff]  ;;  %v47_v9 = vld [vmem:[%s1117_s1 + $0x40] sm:$0xff]  ;;  %v945_v21 = vmov 0  }
   0xe   :  { %v48_v10 = vld [vmem:[%s1117_s1 + $0x48] sm:$0xff]  ;;  %v49_v11 = vld [vmem:[%s1117_s1 + $0x50] sm:$0xff]  ;;  %v50_v12 = vld [vmem:[%s1117_s1 + $0x58] sm:$0xff]  ;;  %914 = vset.pattern.permute.xlu1 %v945_v21  ;;  %913 = vset.pattern.permute.xlu0 %v945_v21 }
   0xf   :  { %v51_v13 = vld [vmem:[%s1117_s1 + $0x60] sm:$0xff]  ;;  %v52_v14 = vld [vmem:[%s1117_s1 + $0x68] sm:$0xff]  ;;  %v53_v15 = vld [vmem:[%s1117_s1 + $0x70] sm:$0xff] }
  0x10   :  { %847 = vmatmul.mubr.msk.f32.gmra.mxu0 %vm56_vm1, %v46_v8  ;;  %v54_v16 = vld [vmem:[%s1117_s1 + $0x78] sm:$0xff]  ;;  %v915_v17 = vld [vmem:[%s1116_s0] sm:$0xff]   ;;  %v916_v18 = vld [vmem:[%s1116_s0 + $0x10] sm:$0xff]  }
  0x11   :  { %849 = vmatprep.mubr.msk.f32.mxu0 %vm56_vm1, %v47_v9  ;;  %881 = vmatprep.mubr.bf16.mxu1 %v916_v18  ;;  %v476_v19 = vld [vmem:[%s1119_s3 + $0x10] sm:$0xff]  ;;  %v474_v20 = vld [vmem:[%s1119_s3] sm:$0xff]  ;;  %v477_v22 = vld [vmem:[%s1119_s3 + $0x18] sm:$0xff] }
  0x12   :  { %518 = vperm.xlu1 %914, %v476_v19   ;;  %508 = vperm.xlu0 %913, %v474_v20   ;;  %v475_v23 = vld [vmem:[%s1119_s3 + $0x8] sm:$0xff]  ;;  %v478_v25 = vld [vmem:[%s1119_s3 + $0x20] sm:$0xff]  ;;  %v481_v26 = vld [vmem:[%s1119_s3 + $0x38] sm:$0xff] }
  0x13   :  { %v479_v24 = vld [vmem:[%s1119_s3 + $0x28] sm:$0xff]  ;;  %v480_v27 = vld [vmem:[%s1119_s3 + $0x30] sm:$0xff]  ;;  %v482_v29 = vld [vmem:[%s1119_s3 + $0x40] sm:$0xff] }
  0x14   :  { %850 = vmatmul.mubr.msk.f32.gmra.mxu0 %vm56_vm1, %v48_v10  ;;  %v483_v28 = vld [vmem:[%s1119_s3 + $0x48] sm:$0xff]  ;;  %v485_v30 = vld [vmem:[%s1119_s3 + $0x58] sm:$0xff]  ;;  %v484_v31 = vld [vmem:[%s1119_s3 + $0x50] sm:$0xff] }
  0x15   :  { %852 = vmatprep.mubr.msk.f32.mxu0 %vm56_vm1, %v49_v11  ;;  %v487_v32 = vld [vmem:[%s1119_s3 + $0x68] sm:$0xff]  ;;  %v486_v33 = vld [vmem:[%s1119_s3 + $0x60] sm:$0xff]  ;;  %v489_v34 = vld [vmem:[%s1119_s3 + $0x78] sm:$0xff] }
  0x16   :  { %523 = vperm.xlu1 %914, %v477_v22   ;;  %513 = vperm.xlu0 %913, %v475_v23   ;;  %v488_v35 = vld [vmem:[%s1119_s3 + $0x70] sm:$0xff]  ;;  %v917_v60 = vld [vmem:[%s1116_s0 + $0x8] sm:$0xff]   ;;  %v918_v61 = vld [vmem:[%s1116_s0 + $0x18] sm:$0xff]  }
  0x17   :  { %v919_v62 = vld [vmem:[%s1116_s0 + $0x20] sm:$0xff]   ;;  %v920_v63 = vld [vmem:[%s1116_s0 + $0x28] sm:$0xff]   ;;  %v921_v0 = vld [vmem:[%s1116_s0 + $0x30] sm:$0xff]  }
  0x18   :  { %853 = vmatmul.mubr.msk.f32.gmra.mxu0 %vm56_vm1, %v50_v12  ;;  %v922_v1 = vld [vmem:[%s1116_s0 + $0x38] sm:$0xff]   ;;  %s946_s0 = smov [#allocation3]  }
  0x19   :  { %855 = vmatprep.mubr.msk.f32.mxu0 %vm56_vm1, %v51_v13  ;;  %s687_s13 = sshll.u32 %s946_s0, 4  ;;  %s688_s13 = int_to_ptr.vmem [resolvable:$true] %s687_s13 }
  0x1a   :  { %533 = vperm.xlu1 %914, %v479_v24   ;;  %528 = vperm.xlu0 %913, %v478_v25   ;;  %s923_s14 = scalar_lea.vmem %s688_s13, 1024  ;;  %p928_p1 = scmp.lt.s32.totalorder %s688_s13, %s688_s13 }
  0x1b   :  { %p924_p0 = scmp.ne.s32.totalorder %s688_s13, %s923_s14  ;;  %p929_p2 = scmp.lt.s32.totalorder %s923_s14, %s923_s14 }
  0x1c   :  { %856 = vmatmul.mubr.msk.f32.gmra.mxu0 %vm56_vm1, %v52_v14 }
  0x1d   :  { %858 = vmatprep.mubr.msk.f32.mxu0 %vm56_vm1, %v53_v15  ;;  %p930_p3 = por %p929_p2, %p928_p1 }
  0x1e   :  { %543 = vperm.xlu1 %914, %v481_v26   ;;  %538 = vperm.xlu0 %913, %v480_v27  }
  0x1f   :  { %p931_p4 = pnand %p930_p3, %p924_p0 }
  0x20   :  { %859 = vmatmul.mubr.msk.f32.gmra.mxu0 %vm56_vm1, %v54_v16 }
  0x21   :  { %877 = vmatprep.mubr.bf16.mxu0 %v915_v17 }
  0x22   :  { %553 = vperm.xlu1 %914, %v483_v28   ;;  %548 = vperm.xlu0 %913, %v482_v29  }
  0x26   :  { %563 = vperm.xlu1 %914, %v485_v30   ;;  %558 = vperm.xlu0 %913, %v484_v31  }
  0x2a   :  { %573 = vperm.xlu1 %914, %v487_v32   ;;  %568 = vperm.xlu0 %913, %v486_v33  }
  0x2e   :  { %583 = vperm.xlu1 %914, %v489_v34   ;;  %578 = vperm.xlu0 %913, %v488_v35  }
  0x8d   :  { %v519_v2 = vpop.permute.xlu1 %518  ;;  %v509_v3 = vpop.permute.xlu0 %508 }
  0x91   :  { %v524_v4 = vpop.permute.xlu1 %523  ;;  %v514_v5 = vpop.permute.xlu0 %513 }
  0x95   :  { %v534_v6 = vpop.permute.xlu1 %533  ;;  %v529_v7 = vpop.permute.xlu0 %528 }
  0x99   :  { %v544_v8 = vpop.permute.xlu1 %543  ;;  %v539_v9 = vpop.permute.xlu0 %538 }
  0x9d   :  { %v554_v12 = vpop.permute.xlu1 %553  ;;  %v549_v13 = vpop.permute.xlu0 %548 }
  0xa1   :  { %v564_v26 = vpop.permute.xlu1 %563  ;;  %v559_v31 = vpop.permute.xlu0 %558 }
  0xc4   :  { %v839_v36 = vpop.f32.mrf.mxu0 }
  0xc6   :  { %v175_v37 = vpop.f32.mrf.mxu0 }
  0xc7   :  { %v286_v59 = vpack.c.bf16 %v839_v36, %v175_v37  ;;  %v574_v37 = vpop.permute.xlu1 %573 }
  0xc8   :  { %v842_v38 = vpop.f32.mrf.mxu0 }
  0xca   :  { %v185_v39 = vpop.f32.mrf.mxu0 }
  0xcb   :  { %v287_v58 = vpack.c.bf16 %v842_v38, %v185_v39 }
  0xcc   :  { %v845_v40 = vpop.f32.mrf.mxu0 }
  0xce   :  { %v195_v41 = vpop.f32.mrf.mxu0 }
  0xcf   :  { %v288_v57 = vpack.c.bf16 %v845_v40, %v195_v41  ;;  %v569_v40 = vpop.permute.xlu0 %568 }
  0xd0   :  { %v848_v42 = vpop.f32.mrf.mxu0 }
  0xd2   :  { %v205_v43 = vpop.f32.mrf.mxu0 }
  0xd3   :  { %v289_v56 = vpack.c.bf16 %v848_v42, %v205_v43 }
  0xd4   :  { %v851_v44 = vpop.f32.mrf.mxu0 }
  0xd6   :  { %v215_v45 = vpop.f32.mrf.mxu0 }
  0xd7   :  { %v290_v55 = vpack.c.bf16 %v851_v44, %v215_v45 }
  0xd8   :  { %v854_v46 = vpop.f32.mrf.mxu0 }
  0xda   :  { %v225_v47 = vpop.f32.mrf.mxu0 }
  0xdb   :  { %v291_v54 = vpack.c.bf16 %v854_v46, %v225_v47 }
  0xdc   :  { %v857_v48 = vpop.f32.mrf.mxu0 }
  0xde   :  { %v235_v49 = vpop.f32.mrf.mxu0 }
  0xdf   :  { %v292_v53 = vpack.c.bf16 %v857_v48, %v235_v49  ;;  %v584_v48 = vpop.permute.xlu1 %583  ;;  %v579_v49 = vpop.permute.xlu0 %578 }
  0xe0   :  { %v860_v50 = vpop.f32.mrf.mxu0 }
  0xe2   :  { %v245_v51 = vpop.f32.mrf.mxu0 }
  0xe3   :  { %v293_v52 = vpack.c.bf16 %v860_v50, %v245_v51 }
  0xe5   :  { %861 = vmatprep.subr.bf16.mxu0 %v293_v52  ;;  %893 = vmatprep.subr.bf16.mxu1 %v293_v52 }
  0xe6   :  { %862 = vmatpush3.bf16.msra.mxu0 %v293_v52  ;;  %901 = vmatpush3.bf16.msra.mxu1 %v293_v52 }
  0xe7   :  { %863 = vmatprep.subr.bf16.mxu0 %v292_v53  ;;  %894 = vmatprep.subr.bf16.mxu1 %v292_v53 }
  0xea   :  { %864 = vmatpush3.bf16.msra.mxu0 %v292_v53  ;;  %902 = vmatpush3.bf16.msra.mxu1 %v292_v53 }
  0xeb   :  { %865 = vmatprep.subr.bf16.mxu0 %v291_v54  ;;  %895 = vmatprep.subr.bf16.mxu1 %v291_v54 }
  0xee   :  { %866 = vmatpush3.bf16.msra.mxu0 %v291_v54  ;;  %903 = vmatpush3.bf16.msra.mxu1 %v291_v54 }
  0xef   :  { %867 = vmatprep.subr.bf16.mxu0 %v290_v55  ;;  %896 = vmatprep.subr.bf16.mxu1 %v290_v55 }
  0xf2   :  { %868 = vmatpush3.bf16.msra.mxu0 %v290_v55  ;;  %904 = vmatpush3.bf16.msra.mxu1 %v290_v55 }
  0xf3   :  { %869 = vmatprep.subr.bf16.mxu0 %v289_v56  ;;  %897 = vmatprep.subr.bf16.mxu1 %v289_v56 }
  0xf6   :  { %870 = vmatpush3.bf16.msra.mxu0 %v289_v56  ;;  %905 = vmatpush3.bf16.msra.mxu1 %v289_v56 }
  0xf7   :  { %871 = vmatprep.subr.bf16.mxu0 %v288_v57  ;;  %898 = vmatprep.subr.bf16.mxu1 %v288_v57 }
  0xfa   :  { %872 = vmatpush3.bf16.msra.mxu0 %v288_v57  ;;  %906 = vmatpush3.bf16.msra.mxu1 %v288_v57 }
  0xfb   :  { %873 = vmatprep.subr.bf16.mxu0 %v287_v58  ;;  %899 = vmatprep.subr.bf16.mxu1 %v287_v58 }
  0xfe   :  { %874 = vmatpush3.bf16.msra.mxu0 %v287_v58  ;;  %907 = vmatpush3.bf16.msra.mxu1 %v287_v58 }
  0xff   :  { %875 = vmatprep.subr.bf16.mxu0 %v286_v59  ;;  %900 = vmatprep.subr.bf16.mxu1 %v286_v59 }
 0x102   :  { %876 = vmatpush3.bf16.msra.mxu0 %v286_v59  ;;  %908 = vmatpush3.bf16.msra.mxu1 %v286_v59 }
 0x105   :  { %878 = vmatmul.mubr.bf16.vlgmr.msra.gmra.mxu0 %v917_v60  ;;  %882 = vmatmul.mubr.bf16.vlgmr.msra.gmra.mxu1 %v918_v61 }
 0x106   :  { %885 = vmatprep.mubr.bf16.mxu1 %v919_v62 }
 0x10d   :  { %886 = vmatmul.mubr.bf16.gmra.mxu1 %v920_v63 }
 0x10e   :  { %889 = vmatprep.mubr.bf16.mxu1 %v921_v0 }
 0x115   :  { %890 = vmatmul.mubr.bf16.gmra.mxu1 %v922_v1 }
 0x1c5   :  { %v879_v10 = vpop.f32.mrf.mxu0  ;;  %v883_v11 = vpop.f32.mrf.mxu1 }
 0x1c6   :  { %v588_v18 = vmul.f32 %v879_v10, %v519_v2  ;;  %v592_v19 = vmul.f32 %v883_v11, %v539_v9 }
 0x1c7   :  { %v376_v14 = vpop.f32.mrf.mxu0  ;;  %v392_v15 = vpop.f32.mrf.mxu1 }
 0x1c8   :  { %v586_v22 = vmul.f32 %v509_v3, %v376_v14  ;;  %v590_v23 = vmul.f32 %v529_v7, %v392_v15 }
 0x1c9   :  { %v880_v16 = vpop.f32.mrf.mxu0  ;;  %v884_v17 = vpop.f32.mrf.mxu1 }
 0x1ca   :  { %v589_v20 = vmul.f32 %v880_v16, %v524_v4  ;;  %v593_v21 = vmul.f32 %v884_v17, %v544_v8 }
 0x1cb   :  { %v379_v24 = vpop.f32.mrf.mxu0  ;;  %v395_v25 = vpop.f32.mrf.mxu1 }
 0x1cc   :  { %v763_v27 = vpack.c.bf16 %v589_v20, %v588_v18  ;;  %v773_v28 = vpack.c.bf16 %v593_v21, %v592_v19  ;;  %v587_v29 = vmul.f32 %v514_v5, %v379_v24  ;;  %v591_v30 = vmul.f32 %v534_v6, %v395_v25 }
 0x1cd   :  { %v887_v32 = vpop.f32.mrf.mxu1 }
 0x1ce   :  { %795 = vst [vmem:[#allocation3 + $0x8] sm:$0xff] %v763_v27   ;;  %797 = vst [vmem:[#allocation3 + $0x18] sm:$0xff] %v773_v28   ;;  %v758_v33 = vpack.c.bf16 %v587_v29, %v586_v22  ;;  %v768_v34 = vpack.c.bf16 %v591_v30, %v590_v23  ;;  %v596_v38 = vmul.f32 %v887_v32, %v559_v31 }
 0x1cf   :  { %v408_v35 = vpop.f32.mrf.mxu1 }
 0x1d0   :  { %759 = vst [vmem:[#allocation3] sm:$0xff] %v758_v33   ;;  %796 = vst [vmem:[#allocation3 + $0x10] sm:$0xff] %v768_v34   ;;  %v594_v42 = vmul.f32 %v549_v13, %v408_v35 }
 0x1d1   :  { %v888_v36 = vpop.f32.mrf.mxu1 }
 0x1d2   :  { %v597_v39 = vmul.f32 %v888_v36, %v564_v26 }
 0x1d3   :  { %v411_v41 = vpop.f32.mrf.mxu1 }
 0x1d4   :  { %v783_v43 = vpack.c.bf16 %v597_v39, %v596_v38  ;;  %v595_v44 = vmul.f32 %v554_v12, %v411_v41 }
 0x1d5   :  { %v891_v45 = vpop.f32.mrf.mxu1 }
 0x1d6   :  { %799 = vst [vmem:[#allocation3 + $0x28] sm:$0xff] %v783_v43   ;;  %v778_v46 = vpack.c.bf16 %v595_v44, %v594_v42  ;;  %v600_v51 = vmul.f32 %v891_v45, %v579_v49 }
 0x1d7   :  { %v424_v47 = vpop.f32.mrf.mxu1 }
 0x1d8   :  { %798 = vst [vmem:[#allocation3 + $0x20] sm:$0xff] %v778_v46   ;;  %v598_v54 = vmul.f32 %v569_v40, %v424_v47 }
 0x1d9   :  { %v892_v50 = vpop.f32.mrf.mxu1 }
 0x1da   :  { %v601_v52 = vmul.f32 %v892_v50, %v584_v48 }
 0x1db   :  { %v427_v53 = vpop.f32.mrf.mxu1 }
 0x1dc   :  { %v793_v55 = vpack.c.bf16 %v601_v52, %v600_v51  ;;  %v599_v56 = vmul.f32 %v574_v37, %v427_v53 }
 0x1de   :  { %801 = vst [vmem:[#allocation3 + $0x38] sm:$0xff] %v793_v55   ;;  %v788_v57 = vpack.c.bf16 %v599_v56, %v598_v54 }
 0x1e0   :  { %800 = vst [vmem:[#allocation3 + $0x30] sm:$0xff] %v788_v57  }
 0x1e1   :  { %934 = shalt.err (!%p931_p4)
}
 0x1e2   :  { %s947_s15 = smov 64   ;;  %s948_s16 = smov 4  }
 0x1e3   :  { %693 = dma.vmem_to_hbm [thread:$0]  %s688_s13, 1024, %s1120_s4, [#allocation4], %s947_s15, %s947_s15, %s948_s16  }
 0x1e4   :  { %943 = dma.done.wait [#allocation4], 1024  }
 0x1e5   :  { %944 = vsyncadd [#allocation4], 4294966272 }
 0x1e6   :  { %697 = vsyncpa [#allocation4], 1 }

</bundles_post_ra>
